<compile_context>
chip_gen: v7x
topology: tpu7x:2x2x1
jax: 0.10.0
libtpu: 0.0.40
codegen_flags: <defaults>
</compile_context>

<pallas_src>
import functools

import jax
import jax.numpy as jnp
from jax.experimental import pallas as pl
from jax.experimental.pallas import tpu as pltpu


# ---------------------------------------------------------------------------
# Pallas kernels
# ---------------------------------------------------------------------------

def _conv_bn_kernel(x_ref, w_ref, s_ref, b_ref, *rest,
                    kh, ow, ohw, relu, has_res):
    """Direct stride-1 conv: KH tap dots on the MXU + fused BN epilogue.

    x_ref: (1, HS*OW, KW*CIN)  bf16   W-direction im2col'd rows of one image
    w_ref: (KH, KW*CIN, TN)    bf16   weight slab for this cout tile
    s_ref, b_ref: (1, TN)      f32    folded BatchNorm scale / bias
    [r_ref]: (1, OHW, TN)      f32    optional residual
    o_ref : (1, OHW, TN)       f32
    """
    if has_res:
        r_ref, o_ref = rest
    else:
        (o_ref,) = rest

    # Tap ki needs rows [ki*OW, ki*OW + OH*OW) -- contiguous, static slices.
    acc = jnp.dot(x_ref[0, 0:ohw, :], w_ref[0],
                  preferred_element_type=jnp.float32)
    for ki in range(1, kh):
        acc = acc + jnp.dot(x_ref[0, ki * ow: ki * ow + ohw, :], w_ref[ki],
                            preferred_element_type=jnp.float32)

    y = acc * s_ref[...] + b_ref[...]          # f32 epilogue
    if has_res:
        y = y + r_ref[0]
    if relu:
        y = jnp.maximum(y, 0.0)
    o_ref[0] = y.astype(o_ref.dtype)


def _maxpool3x3s2_kernel(x_ref, o_ref, *, oh, ow):
    """3x3 / stride-2 / pad-1 max pool on phase-decomposed input.

    x_ref: (4, 1, HP2, WP2, C) f32   phases (p*2+q) leading, one image
    o_ref: (1, OH, OW, C)      f32
    """
    sel = ((0, 0), (0, 1), (1, 0))   # tap ki in {0,1,2} -> (row offset a, phase p)
    m = None
    for a, p in sel:
        for b, q in sel:
            v = x_ref[p * 2 + q, 0, a:a + oh, b:b + ow, :]
            m = v if m is None else jnp.maximum(m, v)
    o_ref[0] = m


def _linear_kernel(x_ref, w_ref, b_ref, o_ref):
    """out = x @ w + b (bias-only epilogue, lane-dense 128-wide output)."""
    o_ref[...] = (jnp.dot(x_ref[...], w_ref[...],
                          preferred_element_type=jnp.float32) + b_ref[...])


# ---------------------------------------------------------------------------
# Host-side helpers (layout plumbing only)
# ---------------------------------------------------------------------------

def _space_to_depth(x):
    """(N, H, W, C) -> (N, H/2, W/2, 4C); channel index = (p*2+q)*C + c."""
    n, h, w, c = x.shape
    assert h % 2 == 0 and w % 2 == 0, "space-to-depth needs even padded dims"
    x = x.reshape(n, h // 2, 2, w // 2, 2, c)
    x = x.transpose(0, 1, 3, 2, 4, 5)
    return x.reshape(n, h // 2, w // 2, 4 * c)


def prep_conv_bn(w_hwio, scale, bias, *, stride, pad):
    """Fold stride into a stride-1 conv (space-to-depth on the weight for s=2)
    and pack the weight as (KH, KW*CIN_eff, COUT) bf16 -- done once at init."""
    kh, kw, cin, cout = w_hwio.shape
    w = w_hwio
    if stride == 2:
        khp, kwp = 2 * ((kh + 1) // 2), 2 * ((kw + 1) // 2)
        w = jnp.pad(w, ((0, khp - kh), (0, kwp - kw), (0, 0), (0, 0)))
        w = w.reshape(khp // 2, 2, kwp // 2, 2, cin, cout)
        w = w.transpose(0, 2, 1, 3, 4, 5).reshape(khp // 2, kwp // 2,
                                                  4 * cin, cout)
        kh, kw, cin = khp // 2, kwp // 2, 4 * cin
    elif stride != 1:
        raise NotImplementedError("only stride 1 or 2")
    w2 = w.reshape(kh, kw * cin, cout).astype(jnp.bfloat16)
    return {
        "w": w2, "kh": kh, "kw": kw, "cout": cout,
        "scale": scale.reshape(1, cout).astype(jnp.float32),
        "bias": bias.reshape(1, cout).astype(jnp.float32),
        "stride": stride, "pad": pad,
    }


def conv_bn(x, cp, *, relu, residual=None):
    """Fused Conv2d(bias=False) + folded BN (+ residual) (+ ReLU). NHWC in/out."""
    n = x.shape[0]
    pad = cp["pad"]
    if pad:
        x = jnp.pad(x, ((0, 0), (pad, pad), (pad, pad), (0, 0)))
    if cp["stride"] == 2:
        x = _space_to_depth(x)
    _, hs, ws, cs = x.shape
    kh, kw, cout = cp["kh"], cp["kw"], cp["cout"]
    oh, ow = hs - kh + 1, ws - kw + 1
    ohw = oh * ow

    # im2col along W only (KW-fold, not KH*KW-fold); KH is reduced in-kernel.
    if kw > 1:
        xw = jnp.concatenate([x[:, :, j:j + ow, :] for j in range(kw)], axis=-1)
    else:
        xw = x[:, :, :ow, :]
    x2 = xw.reshape(n, hs * ow, kw * cs).astype(jnp.bfloat16)
    assert x2.shape[-1] == cp["w"].shape[1]

    tn = cout if cout <= 256 else 256          # lane-dense cout tiles
    ct = cout // tn
    grid = (ct, n)                             # batch inner -> weight DMA'd once/tile

    in_specs = [
        pl.BlockSpec((1, hs * ow, kw * cs), lambda j, i: (i, 0, 0)),
        pl.BlockSpec((kh, kw * cs, tn), lambda j, i: (0, 0, j)),
        pl.BlockSpec((1, tn), lambda j, i: (0, j)),
        pl.BlockSpec((1, tn), lambda j, i: (0, j)),
    ]
    args = [x2, cp["w"], cp["scale"], cp["bias"]]
    if residual is not None:
        res2 = residual.reshape(n, ohw, cout).astype(jnp.float32)
        in_specs.append(pl.BlockSpec((1, ohw, tn), lambda j, i: (i, 0, j)))
        args.append(res2)

    kernel = functools.partial(_conv_bn_kernel, kh=kh, ow=ow, ohw=ohw,
                               relu=relu, has_res=residual is not None)
    out = pl.pallas_call(
        kernel,
        out_shape=jax.ShapeDtypeStruct((n, ohw, cout), jnp.float32),
        grid=grid,
        in_specs=in_specs,
        out_specs=pl.BlockSpec((1, ohw, tn), lambda j, i: (i, 0, j)),
        compiler_params=pltpu.CompilerParams(
            dimension_semantics=("parallel", "parallel")),
    )(*args)
    return out.reshape(n, oh, ow, cout)


def maxpool_3x3_s2_p1(x):
    """MaxPool2d(3, 2, 1) on NHWC input; host does a 1x phase split only."""
    n, h, w, c = x.shape
    oh, ow = (h + 2 - 3) // 2 + 1, (w + 2 - 3) // 2 + 1
    xp = jnp.pad(x, ((0, 0), (1, 1), (1, 1), (0, 0)),
                 constant_values=-jnp.inf)
    hp, wp = h + 2, w + 2
    assert hp % 2 == 0 and wp % 2 == 0
    # xr[p*2+q, n, i, j, c] = xp[n, 2i+p, 2j+q, c]
    xr = xp.reshape(n, hp // 2, 2, wp // 2, 2, c).transpose(2, 4, 0, 1, 3, 5)
    xr = xr.reshape(4, n, hp // 2, wp // 2, c)

    kernel = functools.partial(_maxpool3x3s2_kernel, oh=oh, ow=ow)
    return pl.pallas_call(
        kernel,
        out_shape=jax.ShapeDtypeStruct((n, oh, ow, c), jnp.float32),
        grid=(n,),
        in_specs=[pl.BlockSpec((4, 1, hp // 2, wp // 2, c),
                               lambda i: (0, i, 0, 0, 0))],
        out_specs=pl.BlockSpec((1, oh, ow, c), lambda i: (i, 0, 0, 0)),
        compiler_params=pltpu.CompilerParams(
            dimension_semantics=("parallel",)),
    )(xr)


def linear(feat, w_bf16, b_f32):
    """Final Linear; weight/bias already padded to 128 lanes, bf16 weight."""
    n = feat.shape[0]
    ncls_p = w_bf16.shape[1]
    return pl.pallas_call(
        _linear_kernel,
        out_shape=jax.ShapeDtypeStruct((n, ncls_p), jnp.float32),
    )(feat.astype(jnp.bfloat16), w_bf16, b_f32)


# ---------------------------------------------------------------------------
# Parameter init (deterministic, synthetic; BN folded to scale/bias)
# ---------------------------------------------------------------------------

def _conv_w(key, kh, kw, cin, cout):
    fan_in = kh * kw * cin
    return (jax.random.normal(key, (kh, kw, cin, cout), jnp.float32)
            * jnp.sqrt(2.0 / fan_in))


def _bn_folded(key, c, eps=1e-5):
    k1, k2, k3, k4 = jax.random.split(key, 4)
    gamma = 1.0 + 0.1 * jax.random.normal(k1, (c,), jnp.float32)
    beta = 0.1 * jax.random.normal(k2, (c,), jnp.float32)
    mean = 0.1 * jax.random.normal(k3, (c,), jnp.float32)
    var = 1.0 + 0.1 * jnp.abs(jax.random.normal(k4, (c,), jnp.float32))
    scale = gamma / jnp.sqrt(var + eps)
    bias = beta - mean * scale
    return scale, bias


def init_resnet_params(key, num_block=(1, 1, 1, 1), num_classes=100):
    keys = iter(jax.random.split(key, 256))

    def conv_unit(kh, kw, cin, cout, stride, pad):
        w = _conv_w(next(keys), kh, kw, cin, cout)
        scale, bias = _bn_folded(next(keys), cout)
        return prep_conv_bn(w, scale, bias, stride=stride, pad=pad)

    params = {"stem": conv_unit(7, 7, 3, 64, 2, 3)}

    in_planes = 64
    layers = []
    for planes, nb, stride in zip((64, 128, 256, 512), num_block, (1, 2, 2, 2)):
        blocks = []
        for s in [stride] + [1] * (nb - 1):
            blk = {
                "conv1": conv_unit(3, 3, in_planes, planes, s, 1),
                "conv2": conv_unit(3, 3, planes, planes, 1, 1),
            }
            if s != 1 or in_planes != planes:
                blk["shortcut"] = conv_unit(1, 1, in_planes, planes, s, 0)
            blocks.append(blk)
            in_planes = planes
        layers.append(blocks)
    params["layers"] = layers

    # FC padded to 128 output lanes for unmasked (lane-dense) stores.
    ncls_p = ((num_classes + 127) // 128) * 128
    fc_w = 0.02 * jax.random.normal(next(keys), (512, num_classes), jnp.float32)
    fc_b = 0.1 * jax.random.normal(next(keys), (num_classes,), jnp.float32)
    params["fc_w"] = jnp.pad(fc_w, ((0, 0), (0, ncls_p - num_classes))
                             ).astype(jnp.bfloat16)
    params["fc_b"] = jnp.pad(fc_b, (0, ncls_p - num_classes)
                             ).reshape(1, ncls_p).astype(jnp.float32)
    params["num_classes"] = num_classes
    return params


# ---------------------------------------------------------------------------
# Forward pass
# ---------------------------------------------------------------------------

def basic_block_forward(x, blk):
    h = conv_bn(x, blk["conv1"], relu=True)
    if "shortcut" in blk:
        sc = conv_bn(x, blk["shortcut"], relu=False)
    else:
        sc = x
    # out = relu(bn2(conv2(h)) + shortcut(x)) -- residual + relu fused in-kernel.
    return conv_bn(h, blk["conv2"], relu=True, residual=sc)


def resnet_forward(x_nchw, params):
    x = jnp.transpose(x_nchw, (0, 2, 3, 1)).astype(jnp.float32)  # NCHW -> NHWC
    # Stem: Conv 7x7/2 p3 + BN + ReLU + MaxPool 3x3/2 p1
    x = conv_bn(x, params["stem"], relu=True)
    x = maxpool_3x3_s2_p1(x)
    for blocks in params["layers"]:
        for blk in blocks:
            x = basic_block_forward(x, blk)
    n = x.shape[0]
    feat = x.reshape(n, -1)          # layer4 output is (N, 1, 1, 512) -> (N, 512)
    logits = linear(feat, params["fc_w"], params["fc_b"])
    return logits[:, :params["num_classes"]]


# ---------------------------------------------------------------------------
# Main
# ---------------------------------------------------------------------------

if __name__ == "__main__":
    key = jax.random.PRNGKey(0)
    k_x, k_p = jax.random.split(key)
    # 32x32 input so the flatten before Linear sees exactly 512 features.
    x = jax.random.normal(k_x, (2, 3, 32, 32), jnp.float32)
    params = init_resnet_params(k_p, num_block=(1, 1, 1, 1), num_classes=100)

    out = resnet_forward(x, params)
    out = jax.block_until_ready(out)
    assert out.shape == (2, 100), out.shape
    assert jnp.all(jnp.isfinite(out))
    print("KERNEL_OK")
</pallas_src>

<mosaic_0001>
module attributes {stable_mosaic.version = 11 : i64} {
  func.func @_conv_bn_kernel(%arg0: i32, %arg1: i32, %arg2: memref<1x304x48xbf16, #tpu.memory_space<vmem>>, %arg3: memref<4x48x64xbf16, #tpu.memory_space<vmem>>, %arg4: memref<1x64xf32, #tpu.memory_space<vmem>>, %arg5: memref<1x64xf32, #tpu.memory_space<vmem>>, %arg6: memref<1x256x64xf32, #tpu.memory_space<vmem>>) attributes {dimension_semantics = [#tpu.dimension_semantics<parallel>, #tpu.dimension_semantics<parallel>], iteration_bounds = array<i64: 1, 2>, scalar_prefetch = 0 : i64, scratch_operands = 0 : i64, tpu.core_type = #tpu.core_type<tc>, window_params = [{transform_indices = @transform_0, window_bounds = array<i64: 1, 304, 48>}, {transform_indices = @transform_1, window_bounds = array<i64: 4, 48, 64>}, {transform_indices = @transform_2, window_bounds = array<i64: 1, 64>}, {transform_indices = @transform_3, window_bounds = array<i64: 1, 64>}, {transform_indices = @transform_4, window_bounds = array<i64: 1, 256, 64>}]} {
    %c0 = arith.constant 0 : index
    %c0_0 = arith.constant 0 : index
    %c0_1 = arith.constant 0 : index
    %0 = vector.load %arg2[%c0, %c0_0, %c0_1] : memref<1x304x48xbf16, #tpu.memory_space<vmem>>, vector<1x256x48xbf16>
    %1 = vector.shape_cast %0 : vector<1x256x48xbf16> to vector<256x48xbf16>
    %c0_2 = arith.constant 0 : index
    %c0_3 = arith.constant 0 : index
    %c0_4 = arith.constant 0 : index
    %2 = vector.load %arg3[%c0_2, %c0_3, %c0_4] : memref<4x48x64xbf16, #tpu.memory_space<vmem>>, vector<1x48x64xbf16>
    %3 = vector.shape_cast %2 : vector<1x48x64xbf16> to vector<48x64xbf16>
    %cst = arith.constant dense<0.000000e+00> : vector<256x64xf32>
    %4 = tpu.matmul %1, %3, %cst {dimension_numbers = #tpu.dot_dimension_numbers<[1], [0], [0], [1], [0, 0, 1, 1], [], []>} : vector<256x48xbf16>, vector<48x64xbf16>, vector<256x64xf32> -> vector<256x64xf32>
    %c0_5 = arith.constant 0 : index
    %c16 = arith.constant 16 : index
    %c0_6 = arith.constant 0 : index
    %5 = vector.load %arg2[%c0_5, %c16, %c0_6] : memref<1x304x48xbf16, #tpu.memory_space<vmem>>, vector<1x256x48xbf16>
    %6 = vector.shape_cast %5 : vector<1x256x48xbf16> to vector<256x48xbf16>
    %c1 = arith.constant 1 : index
    %c0_7 = arith.constant 0 : index
    %c0_8 = arith.constant 0 : index
    %7 = vector.load %arg3[%c1, %c0_7, %c0_8] : memref<4x48x64xbf16, #tpu.memory_space<vmem>>, vector<1x48x64xbf16>
    %8 = vector.shape_cast %7 : vector<1x48x64xbf16> to vector<48x64xbf16>
    %cst_9 = arith.constant dense<0.000000e+00> : vector<256x64xf32>
    %9 = tpu.matmul %6, %8, %cst_9 {dimension_numbers = #tpu.dot_dimension_numbers<[1], [0], [0], [1], [0, 0, 1, 1], [], []>} : vector<256x48xbf16>, vector<48x64xbf16>, vector<256x64xf32> -> vector<256x64xf32>
    %10 = arith.addf %4, %9 : vector<256x64xf32>
    %c0_10 = arith.constant 0 : index
    %c32 = arith.constant 32 : index
    %c0_11 = arith.constant 0 : index
    %11 = vector.load %arg2[%c0_10, %c32, %c0_11] : memref<1x304x48xbf16, #tpu.memory_space<vmem>>, vector<1x256x48xbf16>
    %12 = vector.shape_cast %11 : vector<1x256x48xbf16> to vector<256x48xbf16>
    %c2 = arith.constant 2 : index
    %c0_12 = arith.constant 0 : index
    %c0_13 = arith.constant 0 : index
    %13 = vector.load %arg3[%c2, %c0_12, %c0_13] : memref<4x48x64xbf16, #tpu.memory_space<vmem>>, vector<1x48x64xbf16>
    %14 = vector.shape_cast %13 : vector<1x48x64xbf16> to vector<48x64xbf16>
    %cst_14 = arith.constant dense<0.000000e+00> : vector<256x64xf32>
    %15 = tpu.matmul %12, %14, %cst_14 {dimension_numbers = #tpu.dot_dimension_numbers<[1], [0], [0], [1], [0, 0, 1, 1], [], []>} : vector<256x48xbf16>, vector<48x64xbf16>, vector<256x64xf32> -> vector<256x64xf32>
    %16 = arith.addf %10, %15 : vector<256x64xf32>
    %c0_15 = arith.constant 0 : index
    %c48 = arith.constant 48 : index
    %c0_16 = arith.constant 0 : index
    %17 = vector.load %arg2[%c0_15, %c48, %c0_16] : memref<1x304x48xbf16, #tpu.memory_space<vmem>>, vector<1x256x48xbf16>
    %18 = vector.shape_cast %17 : vector<1x256x48xbf16> to vector<256x48xbf16>
    %c3 = arith.constant 3 : index
    %c0_17 = arith.constant 0 : index
    %c0_18 = arith.constant 0 : index
    %19 = vector.load %arg3[%c3, %c0_17, %c0_18] : memref<4x48x64xbf16, #tpu.memory_space<vmem>>, vector<1x48x64xbf16>
    %20 = vector.shape_cast %19 : vector<1x48x64xbf16> to vector<48x64xbf16>
    %cst_19 = arith.constant dense<0.000000e+00> : vector<256x64xf32>
    %21 = tpu.matmul %18, %20, %cst_19 {dimension_numbers = #tpu.dot_dimension_numbers<[1], [0], [0], [1], [0, 0, 1, 1], [], []>} : vector<256x48xbf16>, vector<48x64xbf16>, vector<256x64xf32> -> vector<256x64xf32>
    %22 = arith.addf %16, %21 : vector<256x64xf32>
    %c0_20 = arith.constant 0 : index
    %c0_21 = arith.constant 0 : index
    %23 = vector.load %arg4[%c0_20, %c0_21] : memref<1x64xf32, #tpu.memory_space<vmem>>, vector<1x64xf32>
    %24 = vector.broadcast %23 : vector<1x64xf32> to vector<256x64xf32>
    %25 = arith.mulf %22, %24 : vector<256x64xf32>
    %c0_22 = arith.constant 0 : index
    %c0_23 = arith.constant 0 : index
    %26 = vector.load %arg5[%c0_22, %c0_23] : memref<1x64xf32, #tpu.memory_space<vmem>>, vector<1x64xf32>
    %27 = vector.broadcast %26 : vector<1x64xf32> to vector<256x64xf32>
    %28 = arith.addf %25, %27 : vector<256x64xf32>
    %cst_24 = arith.constant 0.000000e+00 : f32
    %29 = vector.broadcast %cst_24 : f32 to vector<256x64xf32>
    %30 = arith.maximumf %28, %29 : vector<256x64xf32>
    %c0_25 = arith.constant 0 : index
    %c0_26 = arith.constant 0 : index
    %c0_27 = arith.constant 0 : index
    %31 = vector.load %arg6[%c0_25, %c0_26, %c0_27] : memref<1x256x64xf32, #tpu.memory_space<vmem>>, vector<1x256x64xf32>
    %32 = vector.shape_cast %31 : vector<1x256x64xf32> to vector<256x64xf32>
    %33 = vector.shape_cast %30 : vector<256x64xf32> to vector<1x256x64xf32>
    tpu.vector_store %arg6[%c0_25, %c0_26, %c0_27], %33 {strides = array<i32>} : memref<1x256x64xf32, #tpu.memory_space<vmem>>, vector<1x256x64xf32>,
    return
  }
  func.func @transform_0(%arg0: i32, %arg1: i32) -> (i32, i32, i32) {
    %c0_i32 = arith.constant 0 : i32
    %c0_i32_0 = arith.constant 0 : i32
    %c0_i32_1 = arith.constant 0 : i32
    return %arg1, %c0_i32, %c0_i32_0 : i32, i32, i32
  }
  func.func @transform_1(%arg0: i32, %arg1: i32) -> (i32, i32, i32) {
    %c0_i32 = arith.constant 0 : i32
    %c0_i32_0 = arith.constant 0 : i32
    %c0_i32_1 = arith.constant 0 : i32
    return %c0_i32, %c0_i32_0, %arg0 : i32, i32, i32
  }
  func.func @transform_2(%arg0: i32, %arg1: i32) -> (i32, i32) {
    %c0_i32 = arith.constant 0 : i32
    %c0_i32_0 = arith.constant 0 : i32
    return %c0_i32, %arg0 : i32, i32
  }
  func.func @transform_3(%arg0: i32, %arg1: i32) -> (i32, i32) {
    %c0_i32 = arith.constant 0 : i32
    %c0_i32_0 = arith.constant 0 : i32
    return %c0_i32, %arg0 : i32, i32
  }
  func.func @transform_4(%arg0: i32, %arg1: i32) -> (i32, i32, i32) {
    %c0_i32 = arith.constant 0 : i32
    %c0_i32_0 = arith.constant 0 : i32
    return %arg1, %c0_i32, %arg0 : i32, i32, i32
  }
}

</mosaic_0001>

<bundles_post_ra>
// kernel: tpu_custom_call.1
= control target key start
LH: loop header
LB: loop body
LE: loop exit
PB: predicated region body
PF: predicated region fallthrough
CT: control target
= control target key end

     0   :  { %s2440_s15 = smov 0   ;;  %s2442_s16 = smov 0   ;;  %s2804_s0 = inlined_call_operand.vmem [shape: bf16[2,304,48], index: 0, kind: input, shape index: {}]   ;;  %s2805_s1 = inlined_call_operand.vmem [shape: bf16[4,48,64], index: 1, kind: input, shape index: {}]   ;;  %s2806_s2 = inlined_call_operand.vmem [shape: f32[1,64], index: 2, kind: input, shape index: {}]   ;;  %s2807_s3 = inlined_call_operand.vmem [shape: f32[1,64], index: 3, kind: input, shape index: {}]   ;;  %s2808_s4 = inlined_call_operand.vmem [shape: f32[2,256,64], index: 4, kind: output, shape index: {}]  }
   0x1   :  { %s2444_s17 = smov 0  }
   0x2 LB: > { %s23_s18 = sadd.s32 1, %s2409_s16  ;;  %p1829_p0 = scmp.ge.s32.totalorder %s2413_s17, 1  ;;  %s2413_s17 = sphi %s2444_s17, %s14_s17   ;;  %s2409_s16 = sphi %s2442_s16, %s2810_s16   ;;  %s2405_s15 = sphi %s2440_s15, %s2809_s15  }
   0x3   : > { %p24_p1 = scmp.ge.s32.totalorder %s23_s18, 2  ;;  %p201_p2 = scmp.lt.s32.totalorder %s2413_s17, 3 }
   0x5   : > { %s2812_s18 = smov (%p24_p1, %s23_s18), 0  ;;  %p202_p3 = pnand %p1829_p0, %p201_p2 }
   0x6   : > { %v2330_v0 = vld [vmem:[%s2805_s1 + $0x18] sm:$0xff] (!%p202_p3)   ;;  %p240_p4 = scmp.lt.s32.totalorder (!%p202_p3), %s2405_s15, 1  ;;  %v2331_v1 = vld [vmem:[%s2805_s1 + $0x30] sm:$0xff] (!%p202_p3)   ;;  %v2332_v2 = vld [vmem:[%s2805_s1 + $0x20] sm:$0xff] (!%p202_p3)   ;;  %vm409_vm0 = vcmask (!%p202_p3), 392192   ;;  %vm1672_vm1 = vcmask (!%p202_p3), 523264  }
   0x7   : > { %205 = sbr.rel (%p202_p3) target bundleno = 364 (0x16c), region = 36  ;;  %2057 = vmatprep.subr.bf16.mxu1 (!%p202_p3), %v2330_v0  ;;  %2133 = vmatprep.subr.bf16.mxu0 (!%p202_p3), %v2331_v1  ;;  %v2333_v3 = vld [vmem:[%s2805_s1 + $0x38] sm:$0xff] (!%p202_p3)   ;;  %v2334_v4 = vld [vmem:[%s2805_s1 + $0x28] sm:$0xff] (!%p202_p3)   ;;  %v2335_v5 = vld [vmem:[%s2805_s1 + $0x40] sm:$0xff] (!%p202_p3)  }
   0x8   : > { %2058 = vmatpush3.bf16.msra.mxu1 (!%p202_p3), %v2330_v0  ;;  %2134 = vmatpush3.bf16.msra.mxu0 (!%p202_p3), %v2331_v1  ;;  %v2339_v6 = vld [vmem:[%s2805_s1] sm:$0xff] (!%p202_p3)   ;;  %v2341_v11 = vld [vmem:[%s2805_s1 + $0x48] sm:$0xff] (!%p202_p3)   ;;  %v2351_v19 = vld [vmem:[%s2805_s1 + $0x50] sm:$0xff] (!%p202_p3)  }
   0x9   : > { %2059 = vmatprep.subr.bf16.mxu1 (!%p202_p3), %v2332_v2  ;;  %2135 = vmatprep.subr.bf16.mxu0 (!%p202_p3), %v2333_v3  ;;  %v2350_v18 = vld [vmem:[%s2805_s1 + $0x8] sm:$0xff] (!%p202_p3)   ;;  %v2364_v27 = vld [vmem:[%s2805_s1 + $0x10] sm:$0xff] (!%p202_p3)   ;;  %v2365_v28 = vld [vmem:[%s2805_s1 + $0x58] sm:$0xff] (!%p202_p3)  }
   0xa   : > { %v2654_v63 = vld [vmem:[%s2806_s2] ss:$0 sm:$0xff] (!%p202_p3) }
   0xc   : > { %2060 = vmatpush3.bf16.msra.mxu1 (!%p202_p3), %v2332_v2  ;;  %2136 = vmatpush3.bf16.msra.mxu0 (!%p202_p3), %v2333_v3 }
   0xd   : > { %2061 = vmatprep.subr.bf16.mxu1 (!%p202_p3), %v2334_v4  ;;  %2137 = vmatprep.subr.bf16.mxu0 (!%p202_p3), %v2335_v5 }
   0xe   : > { %s2814_s15 = smov (!%p240_p4, %s2405_s15), 1 }
   0xf   : > { %s2305_s29 = smul.u32 152, %s2814_s15 }
  0x10   : > { %2062 = vmatpush3.bf16.msra.mxu1 %v2334_v4  ;;  %2138 = vmatpush3.bf16.msra.mxu0 %v2335_v5  ;;  %v2659_v4 = vld [vmem:[%s2807_s3] ss:$0 sm:$0xff] }
  0x11   : > { %s2482_s8 = scalar_lea.vmem %s2804_s0, %s2305_s29  ;;  %2095 = vmatprep.subr.bf16.mxu1 %v2339_v6  ;;  %2171 = vmatprep.subr.bf16.mxu0 %v2341_v11  ;;  %s1980_s29 = sshll.u32 %s2814_s15, 8 }
  0x12   : > { %v2488_v7 = vld [vmem:[%s2482_s8 + $0x8] sm:$0xff]   ;;  %v2337_v8 = vld [vmem:[%s2482_s8 + $0x10] sm:$0xff]   ;;  %v2340_v10 = vld [vmem:[%s2482_s8 + $0x18] sm:$0xff]   ;;  %s2669_s6 = scalar_lea.vmem %s2808_s4, %s1980_s29 }
  0x13   : > { %2063 = vmatprep.mubr.msk.bf16.mxu1 %vm409_vm0, %v2488_v7  ;;  %v2494_v9 = vld [vmem:[%s2482_s8 + $0x10] sm:$0xff]   ;;  %2139 = vmatprep.mubr.msk.bf16.mxu0 %vm409_vm0, %v2337_v8  ;;  %v2502_v12 = vld [vmem:[%s2482_s8 + $0x18] sm:$0xff]   ;;  %v2343_v13 = vld [vmem:[%s2482_s8 + $0x20] sm:$0xff]  }
  0x14   : > { %2064 = vmatmul.mubr.msk.bf16.vlgmr.msra.gmra.mrb[0].mxu1 %vm409_vm0, %v2494_v9  ;;  %2140 = vmatmul.mubr.msk.bf16.vlgmr.msra.gmra.mrb[0].mxu0 %vm409_vm0, %v2340_v10  ;;  %v2511_v14 = vld [vmem:[%s2482_s8 + $0x20] sm:$0xff]   ;;  %v2345_v15 = vld [vmem:[%s2482_s8 + $0x28] sm:$0xff]   ;;  %v2347_v17 = vld [vmem:[%s2482_s8 + $0x30] sm:$0xff]  }
  0x15   : > { %2096 = vmatpush3.bf16.msra.mxu1 %v2339_v6  ;;  %2172 = vmatpush3.bf16.msra.mxu0 %v2341_v11  ;;  %v2516_v16 = vld [vmem:[%s2482_s8 + $0x28] sm:$0xff]   ;;  %v2532_v20 = vld [vmem:[%s2482_s8 + $0x30] sm:$0xff]   ;;  %v2349_v21 = vld [vmem:[%s2482_s8 + $0x38] sm:$0xff]  }
  0x16   : > { %2067 = vmatprep.mubr.msk.bf16.mxu1 %vm409_vm0, %v2502_v12  ;;  %2143 = vmatprep.mubr.msk.bf16.mxu0 %vm409_vm0, %v2343_v13  ;;  %v2536_v22 = vld [vmem:[%s2482_s8 + $0x38] sm:$0xff]   ;;  %v2353_v23 = vld [vmem:[%s2482_s8 + $0x40] sm:$0xff]   ;;  %v2355_v25 = vld [vmem:[%s2482_s8 + $0x48] sm:$0xff]  }
  0x17   : > { %2097 = vmatprep.subr.bf16.mxu1 %v2350_v18  ;;  %2173 = vmatprep.subr.bf16.mxu0 %v2351_v19  ;;  %v2546_v24 = vld [vmem:[%s2482_s8 + $0x40] sm:$0xff]   ;;  %v2550_v26 = vld [vmem:[%s2482_s8 + $0x48] sm:$0xff]   ;;  %v2357_v29 = vld [vmem:[%s2482_s8 + $0x50] sm:$0xff]  }
  0x18   : > { %v2358_v30 = vld [vmem:[%s2482_s8 + $0x50] sm:$0xff]   ;;  %v2359_v31 = vld [vmem:[%s2482_s8 + $0x58] sm:$0xff]   ;;  %v2361_v33 = vld [vmem:[%s2482_s8 + $0x60] sm:$0xff]  }
  0x19   : > { %2098 = vmatpush3.bf16.msra.mxu1 %v2350_v18  ;;  %2174 = vmatpush3.bf16.msra.mxu0 %v2351_v19  ;;  %v2360_v32 = vld [vmem:[%s2482_s8 + $0x58] sm:$0xff]   ;;  %v2362_v34 = vld [vmem:[%s2482_s8 + $0x60] sm:$0xff]   ;;  %v2363_v35 = vld [vmem:[%s2482_s8 + $0x68] sm:$0xff]  }
  0x1a   : > { %2099 = vmatprep.subr.bf16.mxu1 %v2364_v27  ;;  %2175 = vmatprep.subr.bf16.mxu0 %v2365_v28  ;;  %v2366_v36 = vld [vmem:[%s2482_s8 + $0x68] sm:$0xff]   ;;  %v2367_v37 = vld [vmem:[%s2482_s8 + $0x70] sm:$0xff]   ;;  %v2369_v39 = vld [vmem:[%s2482_s8 + $0x78] sm:$0xff]  }
  0x1b   : > { %v2368_v38 = vld [vmem:[%s2482_s8 + $0x70] sm:$0xff]   ;;  %v2370_v40 = vld [vmem:[%s2482_s8 + $0x78] sm:$0xff]   ;;  %v2371_v41 = vld [vmem:[%s2482_s8 + $0x80] sm:$0xff]  }
  0x1c   : > { %2068 = vmatmul.mubr.msk.bf16.gmra.mrb[4].mxu1 %vm409_vm0, %v2511_v14  ;;  %2144 = vmatmul.mubr.msk.bf16.gmra.mrb[4].mxu0 %vm409_vm0, %v2345_v15  ;;  %v2372_v42 = vld [vmem:[%s2482_s8 + $0x80] sm:$0xff]   ;;  %v2373_v43 = vld [vmem:[%s2482_s8 + $0x88] sm:$0xff]   ;;  %v2375_v45 = vld [vmem:[%s2482_s8 + $0x18] sm:$0xff]  }
  0x1d   : > { %2071 = vmatprep.mubr.msk.bf16.mxu1 %vm409_vm0, %v2516_v16  ;;  %2147 = vmatprep.mubr.msk.bf16.mxu0 %vm409_vm0, %v2347_v17  ;;  %v2374_v44 = vld [vmem:[%s2482_s8] sm:$0xff]   ;;  %v2377_v47 = vld [vmem:[%s2482_s8 + $0x28] sm:$0xff]   ;;  %v2378_v48 = vld [vmem:[%s2482_s8 + $0x30] sm:$0xff]  }
  0x1e   : > { %2100 = vmatpush3.bf16.msra.mxu1 %v2364_v27  ;;  %2176 = vmatpush3.bf16.msra.mxu0 %v2365_v28  ;;  %v2376_v46 = vld [vmem:[%s2482_s8 + $0x20] sm:$0xff]   ;;  %v2379_v49 = vld [vmem:[%s2482_s8 + $0x38] sm:$0xff]   ;;  %v2381_v51 = vld [vmem:[%s2482_s8 + $0x48] sm:$0xff]  }
  0x1f   : > { %v2380_v50 = vld [vmem:[%s2482_s8 + $0x40] sm:$0xff]   ;;  %v2382_v52 = vld [vmem:[%s2482_s8 + $0x50] sm:$0xff]   ;;  %v2383_v53 = vld [vmem:[%s2482_s8 + $0x58] sm:$0xff]  }
  0x20   : > { %v2384_v54 = vld [vmem:[%s2482_s8 + $0x60] sm:$0xff]   ;;  %v2385_v55 = vld [vmem:[%s2482_s8 + $0x68] sm:$0xff]   ;;  %v2386_v56 = vld [vmem:[%s2482_s8 + $0x70] sm:$0xff]  }
  0x21   : > { %v2387_v57 = vld [vmem:[%s2482_s8 + $0x78] sm:$0xff]   ;;  %v2388_v58 = vld [vmem:[%s2482_s8 + $0x80] sm:$0xff]   ;;  %v2389_v59 = vld [vmem:[%s2482_s8 + $0x88] sm:$0xff]  }
  0x22   : > { %v2390_v60 = vld [vmem:[%s2482_s8 + $0x90] sm:$0xff]  }
  0x24   : > { %2072 = vmatmul.mubr.msk.bf16.gmra.mrb[8].mxu1 %vm409_vm0, %v2532_v20  ;;  %2148 = vmatmul.mubr.msk.bf16.gmra.mrb[8].mxu0 %vm409_vm0, %v2349_v21 }
  0x25   : > { %2075 = vmatprep.mubr.msk.bf16.mxu1 %vm409_vm0, %v2536_v22  ;;  %2151 = vmatprep.mubr.msk.bf16.mxu0 %vm409_vm0, %v2353_v23 }
  0x2c   : > { %2076 = vmatmul.mubr.msk.bf16.gmra.mrb[12].mxu1 %vm409_vm0, %v2546_v24  ;;  %2152 = vmatmul.mubr.msk.bf16.gmra.mrb[12].mxu0 %vm409_vm0, %v2355_v25 }
  0x2d   : > { %2079 = vmatprep.mubr.msk.bf16.mxu1 %vm409_vm0, %v2550_v26  ;;  %2155 = vmatprep.mubr.msk.bf16.mxu0 %vm409_vm0, %v2357_v29 }
  0x34   : > { %2080 = vmatmul.mubr.msk.bf16.gmra.mrb[16].mxu1 %vm409_vm0, %v2358_v30  ;;  %2156 = vmatmul.mubr.msk.bf16.gmra.mrb[16].mxu0 %vm409_vm0, %v2359_v31 }
  0x35   : > { %2083 = vmatprep.mubr.msk.bf16.mxu1 %vm409_vm0, %v2360_v32  ;;  %2159 = vmatprep.mubr.msk.bf16.mxu0 %vm409_vm0, %v2361_v33 }
  0x3c   : > { %2084 = vmatmul.mubr.msk.bf16.gmra.mrb[20].mxu1 %vm409_vm0, %v2362_v34  ;;  %2160 = vmatmul.mubr.msk.bf16.gmra.mrb[20].mxu0 %vm409_vm0, %v2363_v35 }
  0x3d   : > { %2087 = vmatprep.mubr.msk.bf16.mxu1 %vm409_vm0, %v2366_v36  ;;  %2163 = vmatprep.mubr.msk.bf16.mxu0 %vm409_vm0, %v2367_v37 }
  0x44   : > { %2088 = vmatmul.mubr.msk.bf16.gmra.mrb[24].mxu1 %vm409_vm0, %v2368_v38  ;;  %2164 = vmatmul.mubr.msk.bf16.gmra.mrb[24].mxu0 %vm409_vm0, %v2369_v39 }
  0x45   : > { %2091 = vmatprep.mubr.msk.bf16.mxu1 %vm409_vm0, %v2370_v40  ;;  %2167 = vmatprep.mubr.msk.bf16.mxu0 %vm409_vm0, %v2371_v41 }
  0x4c   : > { %2092 = vmatmul.mubr.msk.bf16.gmra.mrb[28].mxu1 %vm409_vm0, %v2372_v42  ;;  %2168 = vmatmul.mubr.msk.bf16.gmra.mrb[28].mxu0 %vm409_vm0, %v2373_v43 }
  0x4d   : > { %2101 = vmatprep.mubr.msk.bf16.mxu1 %vm409_vm0, %v2374_v44  ;;  %2177 = vmatprep.mubr.msk.bf16.mxu0 %vm409_vm0, %v2375_v45 }
  0x54   : > { %2102 = vmatmul.mubr.msk.bf16.vlgmr.msra.gmra.mrb[0].mxu1 %vm409_vm0, %v2488_v7  ;;  %2178 = vmatmul.mubr.msk.bf16.vlgmr.msra.gmra.mrb[0].mxu0 %vm409_vm0, %v2376_v46 }
  0x55   : > { %2105 = vmatprep.mubr.msk.bf16.mxu1 %vm409_vm0, %v2494_v9  ;;  %2181 = vmatprep.mubr.msk.bf16.mxu0 %vm409_vm0, %v2377_v47 }
  0x5c   : > { %2106 = vmatmul.mubr.msk.bf16.gmra.mrb[4].mxu1 %vm409_vm0, %v2502_v12  ;;  %2182 = vmatmul.mubr.msk.bf16.gmra.mrb[4].mxu0 %vm409_vm0, %v2378_v48 }
  0x5d   : > { %2109 = vmatprep.mubr.msk.bf16.mxu1 %vm409_vm0, %v2511_v14  ;;  %2185 = vmatprep.mubr.msk.bf16.mxu0 %vm409_vm0, %v2379_v49 }
  0x64   : > { %2110 = vmatmul.mubr.msk.bf16.gmra.mrb[8].mxu1 %vm409_vm0, %v2516_v16  ;;  %2186 = vmatmul.mubr.msk.bf16.gmra.mrb[8].mxu0 %vm409_vm0, %v2380_v50 }
  0x65   : > { %2113 = vmatprep.mubr.msk.bf16.mxu1 %vm409_vm0, %v2532_v20  ;;  %2189 = vmatprep.mubr.msk.bf16.mxu0 %vm409_vm0, %v2381_v51 }
  0x6c   : > { %2114 = vmatmul.mubr.msk.bf16.gmra.mrb[12].mxu1 %vm409_vm0, %v2536_v22  ;;  %2190 = vmatmul.mubr.msk.bf16.gmra.mrb[12].mxu0 %vm409_vm0, %v2382_v52 }
  0x6d   : > { %2117 = vmatprep.mubr.msk.bf16.mxu1 %vm409_vm0, %v2546_v24  ;;  %2193 = vmatprep.mubr.msk.bf16.mxu0 %vm409_vm0, %v2383_v53 }
  0x74   : > { %2118 = vmatmul.mubr.msk.bf16.gmra.mrb[16].mxu1 %vm409_vm0, %v2550_v26  ;;  %2194 = vmatmul.mubr.msk.bf16.gmra.mrb[16].mxu0 %vm409_vm0, %v2384_v54 }
  0x75   : > { %2121 = vmatprep.mubr.msk.bf16.mxu1 %vm409_vm0, %v2358_v30  ;;  %2197 = vmatprep.mubr.msk.bf16.mxu0 %vm409_vm0, %v2385_v55 }
  0x7c   : > { %2122 = vmatmul.mubr.msk.bf16.gmra.mrb[20].mxu1 %vm409_vm0, %v2360_v32  ;;  %2198 = vmatmul.mubr.msk.bf16.gmra.mrb[20].mxu0 %vm409_vm0, %v2386_v56 }
  0x7d   : > { %2125 = vmatprep.mubr.msk.bf16.mxu1 %vm409_vm0, %v2362_v34  ;;  %2201 = vmatprep.mubr.msk.bf16.mxu0 %vm409_vm0, %v2387_v57 }
  0x84   : > { %2126 = vmatmul.mubr.msk.bf16.gmra.mrb[24].mxu1 %vm409_vm0, %v2366_v36  ;;  %2202 = vmatmul.mubr.msk.bf16.gmra.mrb[24].mxu0 %vm409_vm0, %v2388_v58 }
  0x85   : > { %2129 = vmatprep.mubr.msk.bf16.mxu1 %vm409_vm0, %v2368_v38  ;;  %2205 = vmatprep.mubr.msk.bf16.mxu0 %vm409_vm0, %v2389_v59 }
  0x8c   : > { %2130 = vmatmul.mubr.msk.bf16.gmra.mrb[28].mxu1 %vm409_vm0, %v2370_v40  ;;  %2206 = vmatmul.mubr.msk.bf16.gmra.mrb[28].mxu0 %vm409_vm0, %v2390_v60 }
 0x127   : > { %v2103_v61 = vpop.f32.mrb[0].mxu1  ;;  %v2179_v62 = vpop.f32.mrb[0].mxu0 }
 0x128   : > { %v679_v0 = vpop.f32.mrb[1].mxu1  ;;  %v2209_v1 = vadd.f32 %v2179_v62, %v2103_v61  ;;  %v1403_v2 = vpop.f32.mrb[1].mxu0 }
 0x129   : > { %v2104_v3 = vpop.f32.mrb[2].mxu1  ;;  %v2210_v5 = vadd.f32 %v1403_v2, %v679_v0  ;;  %v2180_v6 = vpop.f32.mrb[2].mxu0 }
 0x12a   : > { %v682_v7 = vpop.f32.mrb[3].mxu1  ;;  %v1571_v8 = vmul.f32 %v2209_v1, %v2654_v63  ;;  %v2211_v9 = vadd.f32 %v2180_v6, %v2104_v3  ;;  %v1406_v10 = vpop.f32.mrb[3].mxu0 }
 0x12b   : > { %v1569_v11 = vmul.f32 %v2210_v5, %v2654_v63  ;;  %v2212_v12 = vadd.f32 %v1406_v10, %v682_v7 }
 0x12c   : > { %v1610_v13 = vadd.f32 %v2659_v4, %v1571_v8  ;;  %v1572_v14 = vmul.f32 %v2211_v9, %v2654_v63 }
 0x12d   : > { %v1608_v15 = vadd.f32 %v2659_v4, %v1569_v11  ;;  %v1570_v16 = vmul.f32 %v2212_v12, %v2654_v63 }
 0x12e   : > { %v1642_v17 = vmax.f32 %v1610_v13, 0.0  ;;  %v1611_v18 = vadd.f32 %v2659_v4, %v1572_v14 }
 0x12f   : > { %v2107_v19 = vpop.f32.mrb[4].mxu1  ;;  %v1640_v20 = vmax.f32 %v1608_v15, 0.0  ;;  %v1609_v21 = vadd.f32 %v2659_v4, %v1570_v16  ;;  %v2183_v22 = vpop.f32.mrb[4].mxu0 }
 0x130   : > { %v695_v23 = vpop.f32.mrb[5].mxu1  ;;  %1675 = vst.msk [vmem:[%s2669_s6 + $0x10] sm:$0xff] %vm1672_vm1, %v1642_v17  ;;  %v1643_v24 = vmax.f32 %v1611_v18, 0.0  ;;  %v2213_v25 = vadd.f32 %v2183_v22, %v2107_v19  ;;  %v1419_v26 = vpop.f32.mrb[5].mxu0 }
 0x131   : > { %v2108_v27 = vpop.f32.mrb[6].mxu1  ;;  %1673 = vst.msk [vmem:[%s2669_s6] sm:$0xff] %vm1672_vm1, %v1640_v20  ;;  %v1641_v28 = vmax.f32 %v1609_v21, 0.0  ;;  %v2214_v29 = vadd.f32 %v1419_v26, %v695_v23  ;;  %v2184_v30 = vpop.f32.mrb[6].mxu0 }
 0x132   : > { %v698_v31 = vpop.f32.mrb[7].mxu1  ;;  %1676 = vst.msk [vmem:[%s2669_s6 + $0x18] sm:$0xff] %vm1672_vm1, %v1643_v24  ;;  %v1575_v32 = vmul.f32 %v2213_v25, %v2654_v63  ;;  %v2215_v33 = vadd.f32 %v2184_v30, %v2108_v27  ;;  %v1422_v34 = vpop.f32.mrb[7].mxu0 }
 0x133   : > { %1674 = vst.msk [vmem:[%s2669_s6 + $0x8] sm:$0xff] %vm1672_vm1, %v1641_v28  ;;  %v1573_v35 = vmul.f32 %v2214_v29, %v2654_v63  ;;  %v2216_v36 = vadd.f32 %v1422_v34, %v698_v31 }
 0x134   : > { %v1614_v37 = vadd.f32 %v2659_v4, %v1575_v32  ;;  %v1576_v38 = vmul.f32 %v2215_v33, %v2654_v63 }
 0x135   : > { %v1612_v39 = vadd.f32 %v2659_v4, %v1573_v35  ;;  %v1574_v40 = vmul.f32 %v2216_v36, %v2654_v63 }
 0x136   : > { %v1646_v41 = vmax.f32 %v1614_v37, 0.0  ;;  %v1615_v42 = vadd.f32 %v2659_v4, %v1576_v38 }
 0x137   : > { %v2111_v43 = vpop.f32.mrb[8].mxu1  ;;  %v1644_v44 = vmax.f32 %v1612_v39, 0.0  ;;  %v1613_v45 = vadd.f32 %v2659_v4, %v1574_v40  ;;  %v2187_v46 = vpop.f32.mrb[8].mxu0 }
 0x138   : > { %v711_v47 = vpop.f32.mrb[9].mxu1  ;;  %1679 = vst.msk [vmem:[%s2669_s6 + $0x30] sm:$0xff] %vm1672_vm1, %v1646_v41  ;;  %v1647_v48 = vmax.f32 %v1615_v42, 0.0  ;;  %v2217_v49 = vadd.f32 %v2187_v46, %v2111_v43  ;;  %v1435_v50 = vpop.f32.mrb[9].mxu0 }
 0x139   : > { %v2112_v51 = vpop.f32.mrb[10].mxu1  ;;  %1677 = vst.msk [vmem:[%s2669_s6 + $0x20] sm:$0xff] %vm1672_vm1, %v1644_v44  ;;  %v1645_v52 = vmax.f32 %v1613_v45, 0.0  ;;  %v2218_v53 = vadd.f32 %v1435_v50, %v711_v47  ;;  %v2188_v54 = vpop.f32.mrb[10].mxu0 }
 0x13a   : > { %v714_v55 = vpop.f32.mrb[11].mxu1  ;;  %1680 = vst.msk [vmem:[%s2669_s6 + $0x38] sm:$0xff] %vm1672_vm1, %v1647_v48  ;;  %v1579_v56 = vmul.f32 %v2217_v49, %v2654_v63  ;;  %v2219_v57 = vadd.f32 %v2188_v54, %v2112_v51  ;;  %v1438_v58 = vpop.f32.mrb[11].mxu0 }
 0x13b   : > { %1678 = vst.msk [vmem:[%s2669_s6 + $0x28] sm:$0xff] %vm1672_vm1, %v1645_v52  ;;  %v1577_v59 = vmul.f32 %v2218_v53, %v2654_v63  ;;  %v2220_v60 = vadd.f32 %v1438_v58, %v714_v55 }
 0x13c   : > { %v1618_v61 = vadd.f32 %v2659_v4, %v1579_v56  ;;  %v1580_v62 = vmul.f32 %v2219_v57, %v2654_v63 }
 0x13d   : > { %v1616_v0 = vadd.f32 %v2659_v4, %v1577_v59  ;;  %v1578_v1 = vmul.f32 %v2220_v60, %v2654_v63 }
 0x13e   : > { %v1650_v2 = vmax.f32 %v1618_v61, 0.0  ;;  %v1619_v3 = vadd.f32 %v2659_v4, %v1580_v62 }
 0x13f   : > { %v2115_v5 = vpop.f32.mrb[12].mxu1  ;;  %v1648_v6 = vmax.f32 %v1616_v0, 0.0  ;;  %v1617_v7 = vadd.f32 %v2659_v4, %v1578_v1  ;;  %v2191_v8 = vpop.f32.mrb[12].mxu0 }
 0x140   : > { %v727_v9 = vpop.f32.mrb[13].mxu1  ;;  %1683 = vst.msk [vmem:[%s2669_s6 + $0x50] sm:$0xff] %vm1672_vm1, %v1650_v2  ;;  %v1651_v10 = vmax.f32 %v1619_v3, 0.0  ;;  %v2221_v11 = vadd.f32 %v2191_v8, %v2115_v5  ;;  %v1451_v12 = vpop.f32.mrb[13].mxu0 }
 0x141   : > { %v2116_v13 = vpop.f32.mrb[14].mxu1  ;;  %1681 = vst.msk [vmem:[%s2669_s6 + $0x40] sm:$0xff] %vm1672_vm1, %v1648_v6  ;;  %v1649_v14 = vmax.f32 %v1617_v7, 0.0  ;;  %v2222_v15 = vadd.f32 %v1451_v12, %v727_v9  ;;  %v2192_v16 = vpop.f32.mrb[14].mxu0 }
 0x142   : > { %v730_v17 = vpop.f32.mrb[15].mxu1  ;;  %1684 = vst.msk [vmem:[%s2669_s6 + $0x58] sm:$0xff] %vm1672_vm1, %v1651_v10  ;;  %v1583_v18 = vmul.f32 %v2221_v11, %v2654_v63  ;;  %v2223_v19 = vadd.f32 %v2192_v16, %v2116_v13  ;;  %v1454_v20 = vpop.f32.mrb[15].mxu0 }
 0x143   : > { %1682 = vst.msk [vmem:[%s2669_s6 + $0x48] sm:$0xff] %vm1672_vm1, %v1649_v14  ;;  %v1581_v21 = vmul.f32 %v2222_v15, %v2654_v63  ;;  %v2224_v22 = vadd.f32 %v1454_v20, %v730_v17 }
 0x144   : > { %v1622_v23 = vadd.f32 %v2659_v4, %v1583_v18  ;;  %v1584_v24 = vmul.f32 %v2223_v19, %v2654_v63 }
 0x145   : > { %v1620_v25 = vadd.f32 %v2659_v4, %v1581_v21  ;;  %v1582_v26 = vmul.f32 %v2224_v22, %v2654_v63 }
 0x146   : > { %v1654_v27 = vmax.f32 %v1622_v23, 0.0  ;;  %v1623_v28 = vadd.f32 %v2659_v4, %v1584_v24 }
 0x147   : > { %v2119_v29 = vpop.f32.mrb[16].mxu1  ;;  %v1652_v30 = vmax.f32 %v1620_v25, 0.0  ;;  %v1621_v31 = vadd.f32 %v2659_v4, %v1582_v26  ;;  %v2195_v32 = vpop.f32.mrb[16].mxu0 }
 0x148   : > { %v743_v33 = vpop.f32.mrb[17].mxu1  ;;  %1687 = vst.msk [vmem:[%s2669_s6 + $0x70] sm:$0xff] %vm1672_vm1, %v1654_v27  ;;  %v1655_v34 = vmax.f32 %v1623_v28, 0.0  ;;  %v2225_v35 = vadd.f32 %v2195_v32, %v2119_v29  ;;  %v1467_v36 = vpop.f32.mrb[17].mxu0 }
 0x149   : > { %v2120_v37 = vpop.f32.mrb[18].mxu1  ;;  %1685 = vst.msk [vmem:[%s2669_s6 + $0x60] sm:$0xff] %vm1672_vm1, %v1652_v30  ;;  %v1653_v38 = vmax.f32 %v1621_v31, 0.0  ;;  %v2226_v39 = vadd.f32 %v1467_v36, %v743_v33  ;;  %v2196_v40 = vpop.f32.mrb[18].mxu0 }
 0x14a   : > { %v746_v41 = vpop.f32.mrb[19].mxu1  ;;  %1688 = vst.msk [vmem:[%s2669_s6 + $0x78] sm:$0xff] %vm1672_vm1, %v1655_v34  ;;  %v1587_v42 = vmul.f32 %v2225_v35, %v2654_v63  ;;  %v2227_v43 = vadd.f32 %v2196_v40, %v2120_v37  ;;  %v1470_v44 = vpop.f32.mrb[19].mxu0 }
 0x14b   : > { %1686 = vst.msk [vmem:[%s2669_s6 + $0x68] sm:$0xff] %vm1672_vm1, %v1653_v38  ;;  %v1585_v45 = vmul.f32 %v2226_v39, %v2654_v63  ;;  %v2228_v46 = vadd.f32 %v1470_v44, %v746_v41 }
 0x14c   : > { %v1626_v47 = vadd.f32 %v2659_v4, %v1587_v42  ;;  %v1588_v48 = vmul.f32 %v2227_v43, %v2654_v63 }
 0x14d   : > { %v1624_v49 = vadd.f32 %v2659_v4, %v1585_v45  ;;  %v1586_v50 = vmul.f32 %v2228_v46, %v2654_v63 }
 0x14e   : > { %v1658_v51 = vmax.f32 %v1626_v47, 0.0  ;;  %v1627_v52 = vadd.f32 %v2659_v4, %v1588_v48 }
 0x14f   : > { %v2123_v53 = vpop.f32.mrb[20].mxu1  ;;  %v1656_v54 = vmax.f32 %v1624_v49, 0.0  ;;  %v1625_v55 = vadd.f32 %v2659_v4, %v1586_v50  ;;  %v2199_v56 = vpop.f32.mrb[20].mxu0 }
 0x150   : > { %v759_v57 = vpop.f32.mrb[21].mxu1  ;;  %1691 = vst.msk [vmem:[%s2669_s6 + $0x90] sm:$0xff] %vm1672_vm1, %v1658_v51  ;;  %v1659_v58 = vmax.f32 %v1627_v52, 0.0  ;;  %v2229_v59 = vadd.f32 %v2199_v56, %v2123_v53  ;;  %v1483_v60 = vpop.f32.mrb[21].mxu0 }
 0x151   : > { %v2124_v61 = vpop.f32.mrb[22].mxu1  ;;  %1689 = vst.msk [vmem:[%s2669_s6 + $0x80] sm:$0xff] %vm1672_vm1, %v1656_v54  ;;  %v1657_v62 = vmax.f32 %v1625_v55, 0.0  ;;  %v2230_v0 = vadd.f32 %v1483_v60, %v759_v57  ;;  %v2200_v1 = vpop.f32.mrb[22].mxu0 }
 0x152   : > { %v762_v2 = vpop.f32.mrb[23].mxu1  ;;  %1692 = vst.msk [vmem:[%s2669_s6 + $0x98] sm:$0xff] %vm1672_vm1, %v1659_v58  ;;  %v1591_v3 = vmul.f32 %v2229_v59, %v2654_v63  ;;  %v2231_v5 = vadd.f32 %v2200_v1, %v2124_v61  ;;  %v1486_v6 = vpop.f32.mrb[23].mxu0 }
 0x153   : > { %1690 = vst.msk [vmem:[%s2669_s6 + $0x88] sm:$0xff] %vm1672_vm1, %v1657_v62  ;;  %v1589_v7 = vmul.f32 %v2230_v0, %v2654_v63  ;;  %v2232_v8 = vadd.f32 %v1486_v6, %v762_v2 }
 0x154   : > { %v1630_v9 = vadd.f32 %v2659_v4, %v1591_v3  ;;  %v1592_v10 = vmul.f32 %v2231_v5, %v2654_v63 }
 0x155   : > { %v1628_v11 = vadd.f32 %v2659_v4, %v1589_v7  ;;  %v1590_v12 = vmul.f32 %v2232_v8, %v2654_v63 }
 0x156   : > { %v1662_v13 = vmax.f32 %v1630_v9, 0.0  ;;  %v1631_v14 = vadd.f32 %v2659_v4, %v1592_v10 }
 0x157   : > { %v2127_v15 = vpop.f32.mrb[24].mxu1  ;;  %v1660_v16 = vmax.f32 %v1628_v11, 0.0  ;;  %v1629_v17 = vadd.f32 %v2659_v4, %v1590_v12  ;;  %v2203_v18 = vpop.f32.mrb[24].mxu0 }
 0x158   : > { %v775_v19 = vpop.f32.mrb[25].mxu1  ;;  %1695 = vst.msk [vmem:[%s2669_s6 + $0xb0] sm:$0xff] %vm1672_vm1, %v1662_v13  ;;  %v1663_v20 = vmax.f32 %v1631_v14, 0.0  ;;  %v2233_v21 = vadd.f32 %v2203_v18, %v2127_v15  ;;  %v1499_v22 = vpop.f32.mrb[25].mxu0 }
 0x159   : > { %v2128_v23 = vpop.f32.mrb[26].mxu1  ;;  %1693 = vst.msk [vmem:[%s2669_s6 + $0xa0] sm:$0xff] %vm1672_vm1, %v1660_v16  ;;  %v1661_v24 = vmax.f32 %v1629_v17, 0.0  ;;  %v2234_v25 = vadd.f32 %v1499_v22, %v775_v19  ;;  %v2204_v26 = vpop.f32.mrb[26].mxu0 }
 0x15a   : > { %v778_v27 = vpop.f32.mrb[27].mxu1  ;;  %1696 = vst.msk [vmem:[%s2669_s6 + $0xb8] sm:$0xff] %vm1672_vm1, %v1663_v20  ;;  %v1595_v28 = vmul.f32 %v2233_v21, %v2654_v63  ;;  %v2235_v29 = vadd.f32 %v2204_v26, %v2128_v23  ;;  %v1502_v30 = vpop.f32.mrb[27].mxu0 }
 0x15b   : > { %1694 = vst.msk [vmem:[%s2669_s6 + $0xa8] sm:$0xff] %vm1672_vm1, %v1661_v24  ;;  %v1593_v31 = vmul.f32 %v2234_v25, %v2654_v63  ;;  %v2236_v32 = vadd.f32 %v1502_v30, %v778_v27 }
 0x15c   : > { %v1634_v33 = vadd.f32 %v2659_v4, %v1595_v28  ;;  %v1596_v34 = vmul.f32 %v2235_v29, %v2654_v63 }
 0x15d   : > { %v1632_v35 = vadd.f32 %v2659_v4, %v1593_v31  ;;  %v1594_v36 = vmul.f32 %v2236_v32, %v2654_v63 }
 0x15e   : > { %v1666_v37 = vmax.f32 %v1634_v33, 0.0  ;;  %v1635_v38 = vadd.f32 %v2659_v4, %v1596_v34 }
 0x15f   : > { %v2131_v39 = vpop.f32.mrb[28].mxu1  ;;  %v1664_v40 = vmax.f32 %v1632_v35, 0.0  ;;  %v1633_v41 = vadd.f32 %v2659_v4, %v1594_v36  ;;  %v2207_v42 = vpop.f32.mrb[28].mxu0 }
 0x160   : > { %v791_v43 = vpop.f32.mrb[29].mxu1  ;;  %1699 = vst.msk [vmem:[%s2669_s6 + $0xd0] sm:$0xff] %vm1672_vm1, %v1666_v37  ;;  %v1667_v44 = vmax.f32 %v1635_v38, 0.0  ;;  %v2237_v45 = vadd.f32 %v2207_v42, %v2131_v39  ;;  %v1515_v46 = vpop.f32.mrb[29].mxu0 }
 0x161   : > { %v2132_v47 = vpop.f32.mrb[30].mxu1  ;;  %1697 = vst.msk [vmem:[%s2669_s6 + $0xc0] sm:$0xff] %vm1672_vm1, %v1664_v40  ;;  %v1665_v48 = vmax.f32 %v1633_v41, 0.0  ;;  %v2238_v49 = vadd.f32 %v1515_v46, %v791_v43  ;;  %v2208_v50 = vpop.f32.mrb[30].mxu0 }
 0x162   : > { %v794_v51 = vpop.f32.mrb[31].mxu1  ;;  %1700 = vst.msk [vmem:[%s2669_s6 + $0xd8] sm:$0xff] %vm1672_vm1, %v1667_v44  ;;  %v1599_v52 = vmul.f32 %v2237_v45, %v2654_v63  ;;  %v2239_v53 = vadd.f32 %v2208_v50, %v2132_v47  ;;  %v1518_v54 = vpop.f32.mrb[31].mxu0 }
 0x163   : > { %1698 = vst.msk [vmem:[%s2669_s6 + $0xc8] sm:$0xff] %vm1672_vm1, %v1665_v48  ;;  %v1597_v55 = vmul.f32 %v2238_v49, %v2654_v63  ;;  %v2240_v56 = vadd.f32 %v1518_v54, %v794_v51 }
 0x164   : > { %v1638_v57 = vadd.f32 %v2659_v4, %v1599_v52  ;;  %v1600_v58 = vmul.f32 %v2239_v53, %v2654_v63 }
 0x165   : > { %v1636_v59 = vadd.f32 %v2659_v4, %v1597_v55  ;;  %v1598_v60 = vmul.f32 %v2240_v56, %v2654_v63 }
 0x166   : > { %v1670_v61 = vmax.f32 %v1638_v57, 0.0  ;;  %v1639_v62 = vadd.f32 %v2659_v4, %v1600_v58 }
 0x167   : > { %v1668_v0 = vmax.f32 %v1636_v59, 0.0  ;;  %v1637_v1 = vadd.f32 %v2659_v4, %v1598_v60 }
 0x168   : > { %1703 = vst.msk [vmem:[%s2669_s6 + $0xf0] sm:$0xff] %vm1672_vm1, %v1670_v61  ;;  %v1671_v2 = vmax.f32 %v1639_v62, 0.0 }
 0x169   : > { %1701 = vst.msk [vmem:[%s2669_s6 + $0xe0] sm:$0xff] %vm1672_vm1, %v1668_v0  ;;  %v1669_v3 = vmax.f32 %v1637_v1, 0.0 }
 0x16a   : > { %1704 = vst.msk [vmem:[%s2669_s6 + $0xf8] sm:$0xff] %vm1672_vm1, %v1671_v2 }
 0x16b   : > { %1702 = vst.msk [vmem:[%s2669_s6 + $0xe8] sm:$0xff] %vm1672_vm1, %v1669_v3 }
 0x16c PF: > { %s14_s17 = sadd.s32 1, %s2413_s17   ;;  %s2809_s15 = smov %s2409_s16 }
 0x16d   : > { %p11_p5 = scmp.ge.s32.totalorder %s14_s17, 4   ;;  %s2810_s16 = smov %s2812_s18 }
 0x16f   :  { %13 = sbr.rel (!%p11_p5) target bundleno = 2 (0x2), region = 78 }

</bundles_post_ra>
